<compile_context>
chip_gen: v6e
topology: v6e:2x2x1
jax: 0.10.0
libtpu: 0.0.40
codegen_flags: <defaults>
</compile_context>

<pallas_src>
import functools

import jax
import jax.numpy as jnp
from jax.experimental import pallas as pl
from jax.experimental.pallas import tpu as pltpu

_LANE = 128      # lane width  -> pad weight output dims to this
_SUBLANE = 8     # f32 sublane count -> batch tiles rounded to this


def _round_up(x, m):
    return ((x + m - 1) // m) * m


def _apply_act(y, activation: str):
    """Activation matching torch.nn.{ReLU,Tanh,Sigmoid,Softplus,LeakyReLU,ELU} defaults."""
    if activation == "relu":
        return jnp.maximum(y, 0.0)
    if activation == "tanh":
        return jnp.tanh(y)
    if activation == "sigmoid":
        return jax.nn.sigmoid(y)
    if activation == "softplus":
        return jax.nn.softplus(y)
    if activation == "lrelu":
        return jnp.where(y >= 0.0, y, 0.01 * y)      # LeakyReLU default slope
    if activation == "elu":
        return jnp.where(y >= 0.0, y, jnp.expm1(y))  # ELU alpha=1.0
    if activation == "none":
        return y
    raise ValueError(f"unknown activation {activation}")


@functools.lru_cache(maxsize=1)
def _weight_pipeline_mode():
    """Probe once whether pl.Buffered(1) (single-buffered grid-invariant blocks)
    is accepted by the running jax build; fall back to default pipelining if not."""
    try:
        def _probe(x_ref, o_ref):
            o_ref[...] = x_ref[...]

        spec = pl.BlockSpec((8, 128), lambda i: (0, 0), pipeline_mode=pl.Buffered(1))
        out = pl.pallas_call(
            _probe,
            out_shape=jax.ShapeDtypeStruct((8, 128), jnp.float32),
            grid=(2,),
            in_specs=[spec],
            out_specs=pl.BlockSpec((8, 128), lambda i: (0, 0)),
        )(jnp.ones((8, 128), jnp.float32))
        jax.block_until_ready(out)
        return pl.Buffered(1)
    except Exception:
        return None


# ----------------------------------------------------------------------------
# Fused kernel: the whole MLP for one batch tile.
#   refs = (x_ref, w0, b0, w1, b1, ..., w_{L-1}, b_{L-1}, o_ref)
# Weights are bf16 and lane-padded on dout (zero-padded rows/cols => exact);
# biases are f32.  Activations stay f32; only the dot operands are bf16.
# ----------------------------------------------------------------------------
def _fused_mlp_kernel(*refs, activation: str, num_layers: int):
    x_ref = refs[0]
    o_ref = refs[-1]
    wb = refs[1:-1]

    h = x_ref[...]                                    # (tile_b, d_in)  f32
    for layer in range(num_layers):
        w = wb[2 * layer][...]                        # (din_p, dout_p) bf16
        b = wb[2 * layer + 1][...]                    # (1, dout_p)     f32
        h = jnp.dot(h.astype(jnp.bfloat16), w,
                    preferred_element_type=jnp.float32) + b
        if layer == 0:                                # nonlin only after Linear0
            h = _apply_act(h, activation)
    o_ref[...] = h.astype(o_ref.dtype)


# ----------------------------------------------------------------------------
# One-time parameter preparation (hoisted out of the per-call path):
# cast weights to bf16, lane-pad dout of every layer; layer 0's contraction
# dim (in_dim) is left unpadded.
# ----------------------------------------------------------------------------
def prepare_mlp_params(params, out_params):
    all_layers = list(params) + [out_params]
    in_dim = all_layers[0][0].shape[0]
    dims = tuple([in_dim] + [w.shape[1] for (w, _) in all_layers])

    padded_wb = []
    for li, (w, b) in enumerate(all_layers):
        din, dout = w.shape
        din_p = din if li == 0 else _round_up(din, _LANE)
        dout_p = _round_up(dout, _LANE)
        w_p = (jnp.zeros((din_p, dout_p), jnp.bfloat16)
               .at[:din, :dout].set(w.astype(jnp.bfloat16)))
        b_p = (jnp.zeros((1, dout_p), jnp.float32)
               .at[0, :dout].set(b.astype(jnp.float32)))
        padded_wb += [w_p, b_p]
    return padded_wb, dims


# ----------------------------------------------------------------------------
# Wrapper: single fused pallas_call over batch tiles with resident weights.
# ----------------------------------------------------------------------------
def mlp_forward(x, padded_wb, dims, nonlin: str = "relu", batch_tile: int = 512):
    """Forward pass of the MLP via one fused Pallas kernel.

    x         : (batch, in_dim) array
    padded_wb : flat [w0, b0, w1, b1, ...] from prepare_mlp_params (bf16 W, f32 b)
    dims      : static tuple (in_dim, hidden..., out_dim)
    """
    num_layers = len(padded_wb) // 2
    batch, in_dim = x.shape
    assert in_dim == dims[0], "x feature dim does not match params"

    # padded feature widths seen inside the kernel
    pdims = [in_dim] + [padded_wb[2 * li].shape[1] for li in range(num_layers)]

    f32 = jnp.float32

    # ---- batch tiling ---------------------------------------------------
    tile_b = min(batch_tile, _round_up(batch, _SUBLANE))
    # v7x has 2 TensorCores: prefer >=2 parallel grid steps when that still
    # leaves a >=256-row MXU tile (harmless on v5e/v6e).
    half = _round_up((batch + 1) // 2, _SUBLANE)
    if half >= 256:
        tile_b = min(tile_b, half)
    batch_p = _round_up(batch, tile_b)

    x_f32 = x.astype(f32)
    if batch_p == batch:
        x_p = x_f32
    else:
        x_p = jnp.zeros((batch_p, in_dim), f32).at[:batch].set(x_f32)

    grid = (batch_p // tile_b,)

    # ---- block specs ------------------------------------------------------
    wmode = _weight_pipeline_mode()   # pl.Buffered(1) or None

    def _const_spec(shape):
        if wmode is None:
            return pl.BlockSpec(shape, lambda i: (0, 0))
        return pl.BlockSpec(shape, lambda i: (0, 0), pipeline_mode=wmode)

    in_specs = [pl.BlockSpec((tile_b, in_dim), lambda i: (i, 0))]   # batch-tiled x
    for li in range(num_layers):
        in_specs.append(_const_spec(padded_wb[2 * li].shape))       # resident W (bf16)
        in_specs.append(_const_spec(padded_wb[2 * li + 1].shape))   # resident b (f32)
    out_spec = pl.BlockSpec((tile_b, pdims[-1]), lambda i: (i, 0))  # lane-dense output

    # ---- VMEM budget ------------------------------------------------------
    weight_bytes = sum(int(a.size) * a.dtype.itemsize for a in padded_wb)
    buf_mult = 1 if wmode is not None else 2
    act_bytes = 4 * tile_b * max(pdims)                      # live activation (f32)
    io_bytes = 2 * 4 * tile_b * (in_dim + pdims[-1])         # double-buffered x/out tiles
    vmem_needed = buf_mult * weight_bytes + io_bytes + 2 * act_bytes
    try:
        phys_vmem = int(pltpu.get_tpu_info().vmem_capacity_bytes)
    except Exception:
        phys_vmem = 64 << 20                                 # conservative (v7x per-TC)
    vmem_limit = int(min(max(2 * vmem_needed, 32 << 20), int(0.9 * phys_vmem)))

    # ---- real (unpadded) cost for XLA's scheduler -------------------------
    flops = 2 * batch * sum(dims[i] * dims[i + 1] for i in range(num_layers))
    bytes_accessed = (
        4 * batch * (dims[0] + dims[-1])                                   # x + out (f32)
        + sum(2 * dims[i] * dims[i + 1] + 4 * dims[i + 1]                  # bf16 W + f32 b
              for i in range(num_layers))
    )
    transcendentals = (
        batch * dims[1] if nonlin in ("tanh", "sigmoid", "softplus", "elu") else 0
    )

    kernel = functools.partial(_fused_mlp_kernel, activation=nonlin,
                               num_layers=num_layers)

    out_p = pl.pallas_call(
        kernel,
        out_shape=jax.ShapeDtypeStruct((batch_p, pdims[-1]), f32),
        grid=grid,
        in_specs=in_specs,
        out_specs=out_spec,
        compiler_params=pltpu.CompilerParams(
            dimension_semantics=("parallel",),
            vmem_limit_bytes=vmem_limit,
        ),
        cost_estimate=pl.CostEstimate(
            flops=flops, transcendentals=transcendentals,
            bytes_accessed=bytes_accessed,
        ),
    )(x_p, *padded_wb)

    return out_p[:batch, : dims[-1]]


# ----------------------------------------------------------------------------
# Param init mimicking torch.nn.Linear default (uniform +-1/sqrt(fan_in)).
# ----------------------------------------------------------------------------
def init_mlp_params(key, in_dim, out_dim, hidden_size=(64,)):
    dims = [in_dim] + list(hidden_size)
    params = []
    for i in range(len(dims) - 1):
        key, kw, kb = jax.random.split(key, 3)
        bound = 1.0 / (dims[i] ** 0.5)
        w = jax.random.uniform(kw, (dims[i], dims[i + 1]), jnp.float32, -bound, bound)
        b = jax.random.uniform(kb, (dims[i + 1],), jnp.float32, -bound, bound)
        params.append((w, b))
    key, kw, kb = jax.random.split(key, 3)
    bound = 1.0 / (dims[-1] ** 0.5)
    w_out = jax.random.uniform(kw, (dims[-1], out_dim), jnp.float32, -bound, bound)
    b_out = jax.random.uniform(kb, (out_dim,), jnp.float32, -bound, bound)
    return params, (w_out, b_out)


# Pure-JAX f32 reference (nonlin applied once, after the first Linear).
def mlp_forward_ref(x, params, out_params, nonlin="relu"):
    w0, b0 = params[0]
    h = _apply_act(x @ w0 + b0, nonlin)
    for w, b in params[1:]:
        h = h @ w + b
    w_out, b_out = out_params
    return h @ w_out + b_out


if __name__ == "__main__":
    batch, in_dim, out_dim = 8, 16, 8
    hidden_size = (64, 32)
    nonlin = "relu"

    key = jax.random.PRNGKey(0)
    key, kx = jax.random.split(key)
    x = jax.random.normal(kx, (batch, in_dim), jnp.float32)

    params, out_params = init_mlp_params(key, in_dim, out_dim, hidden_size)

    # One-time weight padding / bf16 cast (hoisted out of the per-call path).
    padded_wb, dims = prepare_mlp_params(params, out_params)

    fwd = jax.jit(functools.partial(mlp_forward, dims=dims, nonlin=nonlin))
    y = jax.block_until_ready(fwd(x, padded_wb))

    y_ref = mlp_forward_ref(x, params, out_params, nonlin=nonlin)
    assert y.shape == (batch, out_dim), f"bad shape {y.shape}"
    # bf16 MXU inputs with f32 accumulation -> loosened tolerance vs f32 reference.
    max_err = jnp.max(jnp.abs(y - y_ref))
    assert jnp.allclose(y, y_ref, atol=2e-2, rtol=2e-2), f"mismatch, max abs err {max_err}"

    print("KERNEL_OK")
</pallas_src>

<mosaic_0001>
module attributes {stable_mosaic.version = 11 : i64} {
  func.func @_fused_mlp_kernel(%arg0: i32, %arg1: memref<8x16xf32, #tpu.memory_space<vmem>>, %arg2: memref<16x128xbf16, #tpu.memory_space<vmem>>, %arg3: memref<1x128xf32, #tpu.memory_space<vmem>>, %arg4: memref<128x128xbf16, #tpu.memory_space<vmem>>, %arg5: memref<1x128xf32, #tpu.memory_space<vmem>>, %arg6: memref<128x128xbf16, #tpu.memory_space<vmem>>, %arg7: memref<1x128xf32, #tpu.memory_space<vmem>>, %arg8: memref<8x128xf32, #tpu.memory_space<vmem>>) attributes {dimension_semantics = [#tpu.dimension_semantics<parallel>], iteration_bounds = array<i64: 1>, scalar_prefetch = 0 : i64, scratch_operands = 0 : i64, tpu.core_type = #tpu.core_type<tc>, window_params = [{transform_indices = @transform_0, window_bounds = array<i64: 8, 16>}, {pipeline_mode = #tpu.pipeline_mode<synchronous>, transform_indices = @transform_1, window_bounds = array<i64: 16, 128>}, {pipeline_mode = #tpu.pipeline_mode<synchronous>, transform_indices = @transform_2, window_bounds = array<i64: 1, 128>}, {pipeline_mode = #tpu.pipeline_mode<synchronous>, transform_indices = @transform_3, window_bounds = array<i64: 128, 128>}, {pipeline_mode = #tpu.pipeline_mode<synchronous>, transform_indices = @transform_4, window_bounds = array<i64: 1, 128>}, {pipeline_mode = #tpu.pipeline_mode<synchronous>, transform_indices = @transform_5, window_bounds = array<i64: 128, 128>}, {pipeline_mode = #tpu.pipeline_mode<synchronous>, transform_indices = @transform_6, window_bounds = array<i64: 1, 128>}, {transform_indices = @transform_7, window_bounds = array<i64: 8, 128>}]} {
    %c0 = arith.constant 0 : index
    %c0_0 = arith.constant 0 : index
    %0 = vector.load %arg1[%c0, %c0_0] : memref<8x16xf32, #tpu.memory_space<vmem>>, vector<8x16xf32>
    %c0_1 = arith.constant 0 : index
    %c0_2 = arith.constant 0 : index
    %1 = vector.load %arg2[%c0_1, %c0_2] : memref<16x128xbf16, #tpu.memory_space<vmem>>, vector<16x128xbf16>
    %c0_3 = arith.constant 0 : index
    %c0_4 = arith.constant 0 : index
    %2 = vector.load %arg3[%c0_3, %c0_4] : memref<1x128xf32, #tpu.memory_space<vmem>>, vector<1x128xf32>
    %3 = arith.truncf %0 : vector<8x16xf32> to vector<8x16xbf16>
    %cst = arith.constant dense<0.000000e+00> : vector<8x128xf32>
    %4 = tpu.matmul %3, %1, %cst {dimension_numbers = #tpu.dot_dimension_numbers<[1], [0], [0], [1], [0, 0, 1, 1], [], []>} : vector<8x16xbf16>, vector<16x128xbf16>, vector<8x128xf32> -> vector<8x128xf32>
    %5 = vector.broadcast %2 : vector<1x128xf32> to vector<8x128xf32>
    %6 = arith.addf %4, %5 : vector<8x128xf32>
    %cst_5 = arith.constant 0.000000e+00 : f32
    %7 = vector.broadcast %cst_5 : f32 to vector<8x128xf32>
    %8 = arith.maximumf %6, %7 : vector<8x128xf32>
    %c0_6 = arith.constant 0 : index
    %c0_7 = arith.constant 0 : index
    %9 = vector.load %arg4[%c0_6, %c0_7] : memref<128x128xbf16, #tpu.memory_space<vmem>>, vector<128x128xbf16>
    %c0_8 = arith.constant 0 : index
    %c0_9 = arith.constant 0 : index
    %10 = vector.load %arg5[%c0_8, %c0_9] : memref<1x128xf32, #tpu.memory_space<vmem>>, vector<1x128xf32>
    %11 = arith.truncf %8 : vector<8x128xf32> to vector<8x128xbf16>
    %cst_10 = arith.constant dense<0.000000e+00> : vector<8x128xf32>
    %12 = tpu.matmul %11, %9, %cst_10 {dimension_numbers = #tpu.dot_dimension_numbers<[1], [0], [0], [1], [0, 0, 1, 1], [], []>} : vector<8x128xbf16>, vector<128x128xbf16>, vector<8x128xf32> -> vector<8x128xf32>
    %13 = vector.broadcast %10 : vector<1x128xf32> to vector<8x128xf32>
    %14 = arith.addf %12, %13 : vector<8x128xf32>
    %c0_11 = arith.constant 0 : index
    %c0_12 = arith.constant 0 : index
    %15 = vector.load %arg6[%c0_11, %c0_12] : memref<128x128xbf16, #tpu.memory_space<vmem>>, vector<128x128xbf16>
    %c0_13 = arith.constant 0 : index
    %c0_14 = arith.constant 0 : index
    %16 = vector.load %arg7[%c0_13, %c0_14] : memref<1x128xf32, #tpu.memory_space<vmem>>, vector<1x128xf32>
    %17 = arith.truncf %14 : vector<8x128xf32> to vector<8x128xbf16>
    %cst_15 = arith.constant dense<0.000000e+00> : vector<8x128xf32>
    %18 = tpu.matmul %17, %15, %cst_15 {dimension_numbers = #tpu.dot_dimension_numbers<[1], [0], [0], [1], [0, 0, 1, 1], [], []>} : vector<8x128xbf16>, vector<128x128xbf16>, vector<8x128xf32> -> vector<8x128xf32>
    %19 = vector.broadcast %16 : vector<1x128xf32> to vector<8x128xf32>
    %20 = arith.addf %18, %19 : vector<8x128xf32>
    %c0_16 = arith.constant 0 : index
    %c0_17 = arith.constant 0 : index
    %21 = vector.load %arg8[%c0_16, %c0_17] : memref<8x128xf32, #tpu.memory_space<vmem>>, vector<8x128xf32>
    tpu.vector_store %arg8[%c0_16, %c0_17], %20 {strides = array<i32>} : memref<8x128xf32, #tpu.memory_space<vmem>>, vector<8x128xf32>,
    return
  }
  func.func @transform_0(%arg0: i32) -> (i32, i32) {
    %c0_i32 = arith.constant 0 : i32
    %c0_i32_0 = arith.constant 0 : i32
    return %arg0, %c0_i32 : i32, i32
  }
  func.func @transform_1(%arg0: i32) -> (i32, i32) {
    %c0_i32 = arith.constant 0 : i32
    %c0_i32_0 = arith.constant 0 : i32
    %c0_i32_1 = arith.constant 0 : i32
    return %c0_i32, %c0_i32_0 : i32, i32
  }
  func.func @transform_2(%arg0: i32) -> (i32, i32) {
    %c0_i32 = arith.constant 0 : i32
    %c0_i32_0 = arith.constant 0 : i32
    %c0_i32_1 = arith.constant 0 : i32
    return %c0_i32, %c0_i32_0 : i32, i32
  }
  func.func @transform_3(%arg0: i32) -> (i32, i32) {
    %c0_i32 = arith.constant 0 : i32
    %c0_i32_0 = arith.constant 0 : i32
    %c0_i32_1 = arith.constant 0 : i32
    return %c0_i32, %c0_i32_0 : i32, i32
  }
  func.func @transform_4(%arg0: i32) -> (i32, i32) {
    %c0_i32 = arith.constant 0 : i32
    %c0_i32_0 = arith.constant 0 : i32
    %c0_i32_1 = arith.constant 0 : i32
    return %c0_i32, %c0_i32_0 : i32, i32
  }
  func.func @transform_5(%arg0: i32) -> (i32, i32) {
    %c0_i32 = arith.constant 0 : i32
    %c0_i32_0 = arith.constant 0 : i32
    %c0_i32_1 = arith.constant 0 : i32
    return %c0_i32, %c0_i32_0 : i32, i32
  }
  func.func @transform_6(%arg0: i32) -> (i32, i32) {
    %c0_i32 = arith.constant 0 : i32
    %c0_i32_0 = arith.constant 0 : i32
    %c0_i32_1 = arith.constant 0 : i32
    return %c0_i32, %c0_i32_0 : i32, i32
  }
  func.func @transform_7(%arg0: i32) -> (i32, i32) {
    %c0_i32 = arith.constant 0 : i32
    %c0_i32_0 = arith.constant 0 : i32
    return %arg0, %c0_i32 : i32, i32
  }
}

</mosaic_0001>

<bundles_post_ra>
// kernel: mlp_forward.1
= control target key start
LH: loop header
LB: loop body
LE: loop exit
PB: predicated region body
PF: predicated region fallthrough
CT: control target
= control target key end

     0   :  { %12 = vsyncpa [#allocation3], 0  ;;  %s688_s0 = inlined_call_operand.hbm [shape: f32[8,16], index: 0, kind: input, shape index: {}]   ;;  %s689_s1 = inlined_call_operand.hbm [shape: bf16[16,128], index: 1, kind: input, shape index: {}]   ;;  %s690_s2 = inlined_call_operand.vmem [shape: f32[1,128], index: 2, kind: input, shape index: {}]   ;;  %s691_s3 = inlined_call_operand.hbm [shape: bf16[128,128], index: 3, kind: input, shape index: {}]   ;;  %s692_s4 = inlined_call_operand.vmem [shape: f32[1,128], index: 4, kind: input, shape index: {}]   ;;  %s693_s5 = inlined_call_operand.hbm [shape: bf16[128,128], index: 5, kind: input, shape index: {}]   ;;  %s694_s6 = inlined_call_operand.vmem [shape: f32[1,128], index: 6, kind: input, shape index: {}]   ;;  %s695_s7 = inlined_call_operand.hbm [shape: f32[8,128], index: 7, kind: output, shape index: {}]  }
   0x1   :  { %13 = vsyncpa [#allocation6], 0 }
   0x2   :  { %14 = vsyncpa [#allocation9], 0 }
   0x3   :  { %15 = vsyncpa [#allocation4], 0  ;;  %s606_s24 = smov [#allocation5]  }
   0x4   :  { %s31_s25 = sshll.u32 %s606_s24, 4  ;;  %s32_s25 = int_to_ptr.vmem [resolvable:$true] %s31_s25 }
   0x5   :  { %s506_s26 = scalar_lea.vmem %s32_s25, 128  ;;  %p511_p1 = scmp.lt.s32.totalorder %s32_s25, %s32_s25 }
   0x6   :  { %p507_p0 = scmp.ne.s32.totalorder %s32_s25, %s506_s26  ;;  %p512_p2 = scmp.lt.s32.totalorder %s506_s26, %s506_s26 }
   0x8   :  { %p513_p3 = por %p512_p2, %p511_p1 }
   0xa   :  { %p514_p4 = pnand %p513_p3, %p507_p0 }
   0xc   :  { %517 = shalt.err (!%p514_p4)
}
   0xd   :  { %s607_s27 = smov 64   ;;  %s608_s28 = smov 4  }
   0xe   :  { %37 = dma.hbm_to_vmem [thread:$0]  %s689_s1, 128, %s32_s25, [#allocation6], %s607_s27, %s607_s27, %s608_s28  }
   0xf   :  { %s609_s8 = smov [#allocation2]   ;;  %s610_s10 = smov [#allocation7]  }
  0x10   :  { %s22_s9 = sshll.u32 %s609_s8, 4  ;;  %s45_s11 = sshll.u32 %s610_s10, 4  ;;  %s23_s9 = int_to_ptr.vmem [resolvable:$true] %s22_s9  ;;  %s46_s11 = int_to_ptr.vmem [resolvable:$true] %s45_s11 }
  0x11   :  { %s526_s12 = scalar_lea.vmem %s23_s9, 128  ;;  %p531_p6 = scmp.lt.s32.totalorder %s23_s9, %s23_s9 }
  0x12   :  { %p527_p5 = scmp.ne.s32.totalorder %s23_s9, %s526_s12  ;;  %p532_p7 = scmp.lt.s32.totalorder %s526_s12, %s526_s12 }
  0x14   :  { %p533_p8 = por %p532_p7, %p531_p6 }
  0x16   :  { %p534_p9 = pnand %p533_p8, %p527_p5 }
  0x18   :  { %537 = shalt.err (!%p534_p9)
}
  0x19   :  { %25 = dma.hbm_to_vmem [thread:$0]  %s688_s0, 128, %s23_s9, [#allocation3]  }
  0x1a   :  { %s546_s15 = scalar_lea.vmem %s46_s11, 1024  ;;  %p551_p11 = scmp.lt.s32.totalorder %s46_s11, %s46_s11 }
  0x1b   :  { %p547_p10 = scmp.ne.s32.totalorder %s46_s11, %s546_s15  ;;  %p552_p12 = scmp.lt.s32.totalorder %s546_s15, %s546_s15 }
  0x1d   :  { %p553_p13 = por %p552_p12, %p551_p11 }
  0x1f   :  { %p554_p0 = pnand %p553_p13, %p547_p10 }
  0x21   :  { %557 = shalt.err (!%p554_p0)
}
  0x22   :  { %51 = dma.hbm_to_vmem [thread:$0]  %s691_s3, 1024, %s46_s11, [#allocation6], %s607_s27, %s607_s27, %s608_s28  }
  0x23   :  { %s611_s17 = smov [#allocation8]  }
  0x24   :  { %s59_s18 = sshll.u32 %s611_s17, 4  ;;  %s60_s18 = int_to_ptr.vmem [resolvable:$true] %s59_s18 }
  0x25   :  { %s566_s19 = scalar_lea.vmem %s60_s18, 1024  ;;  %p571_p2 = scmp.lt.s32.totalorder %s60_s18, %s60_s18 }
  0x26   :  { %p567_p1 = scmp.ne.s32.totalorder %s60_s18, %s566_s19  ;;  %p572_p3 = scmp.lt.s32.totalorder %s566_s19, %s566_s19 }
  0x28   :  { %p573_p4 = por %p572_p3, %p571_p2 }
  0x2a   :  { %p574_p5 = pnand %p573_p4, %p567_p1 }
  0x2c   :  { %577 = shalt.err (!%p574_p5)
}
  0x2d   :  { %65 = dma.hbm_to_vmem [thread:$0]  %s693_s5, 1024, %s60_s18, [#allocation9], %s607_s27, %s607_s27, %s608_s28  }
  0x2e   :  { %598 = dma.done.wait [#allocation3], 128  }
  0x2f   :  { %599 = vsyncadd [#allocation3], 4294967168 }
  0x30   :  { %600 = dma.done.wait [#allocation6], 1152  }
  0x31   :  { %601 = vsyncadd [#allocation6], 4294966144 }
  0x32   :  { %602 = dma.done.wait [#allocation9], 1024  }
  0x33   :  { %603 = vsyncadd [#allocation9], 4294966272  ;;  %v612_v0 = vmov 0.0   ;;  %vm613_vm0 = vmmov 0   ;;  %v481_v1 = vld [vmem:[#allocation5] sm:$0xff]   ;;  %v81_v2 = vld [vmem:[#allocation2] sm:$0xff] }
  0x34   :  { %426 = vmatprep.subr.bf16.mxu0 %v612_v0  ;;  %428 = vmatprep.mubr.msk.bf16.mxu0 %vm613_vm0, %v612_v0  ;;  %v85_v3 = vpack.c.bf16 %v81_v2, %v81_v2  ;;  %vm98_vm1 = vcmask 130048   ;;  %v482_v4 = vld [vmem:[#allocation7 + $0x38] sm:$0xff]   ;;  %v483_v5 = vld [vmem:[#allocation7 + $0x30] sm:$0xff]   ;;  %v484_v6 = vld [vmem:[#allocation7 + $0x28] sm:$0xff]   ;;  %s614_s24 = smov [#allocation10]  }
  0x35   :  { %432 = vmatprep.subr.bf16.mxu1 %v612_v0  ;;  %448 = vmatprep.mubr.msk.bf16.mxu1 %vm613_vm0, %v612_v0  ;;  %v485_v7 = vld [vmem:[#allocation7 + $0x20] sm:$0xff]   ;;  %v486_v8 = vld [vmem:[#allocation7 + $0x18] sm:$0xff]   ;;  %v487_v9 = vld [vmem:[#allocation7 + $0x10] sm:$0xff]   ;;  %s374_s25 = sshll.u32 %s614_s24, 4  ;;  %s375_s25 = int_to_ptr.vmem [resolvable:$true] %s374_s25 }
  0x36   :  { %427 = vmatpush3.bf16.msra.mxu0 %v481_v1  ;;  %433 = vmatpush3.bf16.msra.mxu1 %v482_v4  ;;  %v488_v10 = vld [vmem:[#allocation7 + $0x8] sm:$0xff]   ;;  %v489_v11 = vld [vmem:[#allocation7] sm:$0xff]   ;;  %v490_v12 = vld [vmem:[#allocation8 + $0x38] sm:$0xff]   ;;  %p583_p7 = scmp.lt.s32.totalorder %s375_s25, %s375_s25 }
  0x37   :  { %452 = vmatprep.subr.bf16.mxu0 %v612_v0  ;;  %434 = vmatprep.subr.bf16.mxu1 %v612_v0  ;;  %v491_v13 = vld [vmem:[#allocation8 + $0x30] sm:$0xff]   ;;  %v492_v14 = vld [vmem:[#allocation8 + $0x28] sm:$0xff]   ;;  %v493_v15 = vld [vmem:[#allocation8 + $0x20] sm:$0xff]  }
  0x38   :  { %v494_v16 = vld [vmem:[#allocation8 + $0x18] sm:$0xff]   ;;  %v495_v17 = vld [vmem:[#allocation8 + $0x10] sm:$0xff]   ;;  %v496_v18 = vld [vmem:[#allocation8 + $0x8] sm:$0xff]  }
  0x39   :  { %429 = vmatmul.mubr.msk.bf16.vlgmr.msra.gmra.mxu0 %vm98_vm1, %v85_v3  ;;  %v385_v19 = vld [vmem:[%s690_s2] ss:$0 sm:$0xff]  ;;  %v497_v27 = vld [vmem:[#allocation8] sm:$0xff]  }
  0x3a   :  { %468 = vmatprep.mubr.msk.bf16.mxu0 %vm613_vm0, %v612_v0  ;;  %435 = vmatpush3.bf16.msra.mxu1 %v483_v5  ;;  %v388_v28 = vld [vmem:[%s692_s4] ss:$0 sm:$0xff]  ;;  %s578_s4 = scalar_lea.vmem %s375_s25, 128 }
  0x3b   :  { %436 = vmatprep.subr.bf16.mxu1 %v612_v0  ;;  %453 = vmatpush3.bf16.msra.mxu0 %v490_v12  ;;  %v397_v35 = vld [vmem:[%s694_s6] ss:$0 sm:$0xff]  ;;  %p579_p6 = scmp.ne.s32.totalorder %s375_s25, %s578_s4  ;;  %p584_p8 = scmp.lt.s32.totalorder %s578_s4, %s578_s4 }
  0x3c   :  { %454 = vmatprep.subr.bf16.mxu0 %v612_v0 }
  0x3d   :  { %p585_p9 = por %p584_p8, %p583_p7 }
  0x3e   :  { %437 = vmatpush3.bf16.msra.mxu1 %v484_v6 }
  0x3f   :  { %438 = vmatprep.subr.bf16.mxu1 %v612_v0  ;;  %455 = vmatpush3.bf16.msra.mxu0 %v491_v13  ;;  %p586_p10 = pnand %p585_p9, %p579_p6 }
  0x40   :  { %456 = vmatprep.subr.bf16.mxu0 %v612_v0 }
  0x42   :  { %439 = vmatpush3.bf16.msra.mxu1 %v485_v7 }
  0x43   :  { %440 = vmatprep.subr.bf16.mxu1 %v612_v0  ;;  %457 = vmatpush3.bf16.msra.mxu0 %v492_v14 }
  0x44   :  { %458 = vmatprep.subr.bf16.mxu0 %v612_v0 }
  0x46   :  { %441 = vmatpush3.bf16.msra.mxu1 %v486_v8 }
  0x47   :  { %442 = vmatprep.subr.bf16.mxu1 %v612_v0  ;;  %459 = vmatpush3.bf16.msra.mxu0 %v493_v15 }
  0x48   :  { %460 = vmatprep.subr.bf16.mxu0 %v612_v0 }
  0x4a   :  { %443 = vmatpush3.bf16.msra.mxu1 %v487_v9 }
  0x4b   :  { %444 = vmatprep.subr.bf16.mxu1 %v612_v0  ;;  %461 = vmatpush3.bf16.msra.mxu0 %v494_v16 }
  0x4c   :  { %462 = vmatprep.subr.bf16.mxu0 %v612_v0 }
  0x4e   :  { %445 = vmatpush3.bf16.msra.mxu1 %v488_v10 }
  0x4f   :  { %446 = vmatprep.subr.bf16.mxu1 %v612_v0  ;;  %463 = vmatpush3.bf16.msra.mxu0 %v495_v17 }
  0x50   :  { %464 = vmatprep.subr.bf16.mxu0 %v612_v0 }
  0x52   :  { %447 = vmatpush3.bf16.msra.mxu1 %v489_v11 }
  0x53   :  { %465 = vmatpush3.bf16.msra.mxu0 %v496_v18 }
  0x54   :  { %466 = vmatprep.subr.bf16.mxu0 %v612_v0 }
  0x57   :  { %467 = vmatpush3.bf16.msra.mxu0 %v497_v27 }
  0xf9   :  { %v136_v20 = vpop.f32.mrf.mxu0 }
  0xfa   :  { %v137_v21 = vadd.f32 %v385_v19, %v136_v20 }
  0xfb   :  { %v430_v22 = vpop.f32.mrf.mxu0 }
  0xfc   :  { %v142_v23 = vmax.f32 %v137_v21, 0.0 }
  0xfd   :  { %v139_v24 = vpop.f32.mrf.mxu0 }
  0xfe   :  { %v160_v25 = vpack.c.bf16 %v142_v23, %v142_v23 }
  0xff   :  { %v431_v26 = vpop.f32.mrf.mxu0 }
 0x100   :  { %449 = vmatmul.mubr.bf16.vlgmr.msra.gmra.mxu1 %v160_v25 }
 0x1c0   :  { %v249_v29 = vpop.f32.mrf.mxu1 }
 0x1c1   :  { %v250_v30 = vadd.f32 %v388_v28, %v249_v29 }
 0x1c2   :  { %v450_v31 = vpop.f32.mrf.mxu1 }
 0x1c3   :  { %v272_v32 = vpack.c.bf16 %v250_v30, %v250_v30 }
 0x1c4   :  { %v252_v33 = vpop.f32.mrf.mxu1 }
 0x1c5   :  { %469 = vmatmul.mubr.bf16.vlgmr.msra.gmra.mxu0 %v272_v32 }
 0x1c6   :  { %v451_v34 = vpop.f32.mrf.mxu1 }
 0x285   :  { %v361_v36 = vpop.f32.mrf.mxu0 }
 0x286   :  { %v362_v37 = vadd.f32 %v397_v35, %v361_v36 }
 0x287   :  { %v470_v38 = vpop.f32.mrf.mxu0 }
 0x288   :  { %367 = vst [vmem:[#allocation10] sm:$0xff] %v362_v37 }
 0x289   :  { %v364_v39 = vpop.f32.mrf.mxu0 }
 0x28a   :  { %589 = shalt.err (!%p586_p10)
}
 0x28b   :  { %377 = dma.vmem_to_hbm [thread:$0]  %s375_s25, 128, %s695_s7, [#allocation4]   ;;  %v471_v40 = vpop.f32.mrf.mxu0 }
 0x28c   :  { %604 = dma.done.wait [#allocation4], 128  }
 0x28d   :  { %605 = vsyncadd [#allocation4], 4294967168 }
 0x28e   :  { %381 = vsyncpa [#allocation3], 1 }
 0x28f   :  { %382 = vsyncpa [#allocation6], 1 }
 0x290   :  { %383 = vsyncpa [#allocation9], 1 }
 0x291   :  { %384 = vsyncpa [#allocation4], 1 }

</bundles_post_ra>
